<compile_context>
chip_gen: v6e
topology: v6e:2x2x1
jax: 0.10.0
libtpu: 0.0.40
codegen_flags: <defaults>
</compile_context>

<pallas_src>
import jax
import jax.numpy as jnp
from jax.experimental import pallas as pl
from jax.experimental.pallas import tpu as pltpu

EPS = 1e-12  # torch.nn.functional.normalize default eps


def _score_kernel(ctx_ref, qry_ref, out_ref):
    # ctx_ref: (TN, D) context CLS rows for this batch tile (native dtype)
    # qry_ref: (1, D)  query CLS row (grid-invariant block, native dtype)
    # out_ref: (1, TN) lane-dense scores, f32
    ctx = ctx_ref[...]                        # no blanket upcast of the big tile
    qry_f32 = qry_ref[...].astype(jnp.float32)

    # F.normalize: x / max(||x||, eps)  ==  x * rsqrt(max(||x||^2, eps^2))
    qry_inv = jax.lax.rsqrt(
        jnp.maximum(jnp.sum(qry_f32 * qry_f32, axis=-1, keepdims=True),
                    EPS * EPS))                       # (1, 1), f32

    # Raw scores: (1, D) contracted with (TN, D) over D -> (1, TN) lane-dense.
    # MXU consumes native dtype (bf16 or f32), accumulates in f32.
    raw = jax.lax.dot_general(
        qry_ref[...], ctx,
        dimension_numbers=(((1,), (1,)), ((), ())),
        preferred_element_type=jnp.float32)           # (1, TN)

    # Per-row squared norms of ctx, lane-dense via a ones-vector MXU pass:
    # (1, D) . (TN, D)^T over D -> (1, TN).  Products are exact in the f32
    # accumulator even for bf16 inputs.
    sq = ctx * ctx
    ones_row = jnp.ones((1, ctx.shape[-1]), dtype=ctx.dtype)
    norm2 = jax.lax.dot_general(
        ones_row, sq,
        dimension_numbers=(((1,), (1,)), ((), ())),
        preferred_element_type=jnp.float32)           # (1, TN)

    ctx_inv = jax.lax.rsqrt(jnp.maximum(norm2, EPS * EPS))  # (1, TN), EUP
    out_ref[...] = (raw * ctx_inv * qry_inv).astype(out_ref.dtype)


def _pick_tile(N, D, itemsize, block_n):
    """Batch tile size: big (HBM/overhead-bound kernel), VMEM-capped, and
    giving >= 2 grid steps when N permits (v7x has 2 TensorCores)."""
    if block_n is not None:
        tn = N if N <= block_n else block_n
        assert tn == N or tn % 128 == 0
        return tn
    if N <= 128:
        return N  # single full-extent block (any N is legal as a full dim)
    # 8 MiB per ctx buffer -> 16 MiB double-buffered, safe under the 32 MiB
    # scoped limit requested below on v5e/v6e/v7x.
    per_buf = 8 << 20
    cap = max(128, min(2048, (per_buf // (D * itemsize)) // 128 * 128))
    half = ((pl.cdiv(N, 2) + 127) // 128) * 128   # >= 2 steps when possible
    return min(cap, half)


def score_function2(ctx_hidden, qry_hidden, *, block_n=None):
    """ctx_hidden: (N, S, D), qry_hidden: (1, S, D)  ->  scores (N,) f32.

    D (the lane axis) must be a multiple of 128 (BERT's 768 qualifies).
    Inputs may be f32 or bf16; bf16 halves HBM DMA (the roofline).
    """
    N, S, D = ctx_hidden.shape
    Q, Sq, Dq = qry_hidden.shape
    assert Q == 1 and Dq == D
    assert D % 128 == 0
    assert ctx_hidden.dtype == qry_hidden.dtype

    # Free (contiguous) reshape: the CLS row of each sequence becomes exactly
    # the first D columns, so the kernel only DMAs those columns.
    ctx2d = ctx_hidden.reshape(N, S * D)
    qry2d = qry_hidden.reshape(1, Sq * D)

    itemsize = jnp.dtype(ctx_hidden.dtype).itemsize
    tn = _pick_tile(N, D, itemsize, block_n)

    # Ragged last tiles are safe: padded input rows only affect their own
    # output lanes, and out-of-bounds output lanes are dropped by Pallas.
    out = pl.pallas_call(
        _score_kernel,
        out_shape=jax.ShapeDtypeStruct((1, N), jnp.float32),
        grid=(pl.cdiv(N, tn),),
        in_specs=[
            pl.BlockSpec((tn, D), lambda i: (i, 0)),  # ctx CLS rows, tiled on N
            pl.BlockSpec((1, D), lambda i: (0, 0)),   # query CLS row, invariant
        ],
        out_specs=pl.BlockSpec((1, tn), lambda i: (0, i)),
        compiler_params=pltpu.CompilerParams(
            dimension_semantics=("parallel",),
            vmem_limit_bytes=32 << 20),
    )(ctx2d, qry2d)
    return out[0, :]  # mirrors torch.inner(...).squeeze(-1) -> (N,)


def _reference(ctx_hidden, qry_hidden):
    ctx_cls = ctx_hidden[:, 0, :].astype(jnp.float32)
    qry_cls = qry_hidden[:, 0, :].astype(jnp.float32)
    ctx_emb = ctx_cls / jnp.maximum(
        jnp.linalg.norm(ctx_cls, axis=-1, keepdims=True), EPS)
    qry_emb = qry_cls / jnp.maximum(
        jnp.linalg.norm(qry_cls, axis=-1, keepdims=True), EPS)
    return (ctx_emb @ qry_emb.T)[:, 0]


if __name__ == "__main__":
    key = jax.random.PRNGKey(0)
    k1, k2, k3, k4 = jax.random.split(key, 4)

    # Test 1: small f32 shapes (tight tolerance), single full-extent block.
    # 8 candidate sentences, seq len 8, hidden 128 (lane-aligned stand-in for
    # BERT's 768-dim last_hidden_state).
    N, S, D = 8, 8, 128
    ctx_hidden = jax.random.normal(k1, (N, S, D), dtype=jnp.float32)
    qry_hidden = jax.random.normal(k2, (1, S, D), dtype=jnp.float32)
    scores = jax.block_until_ready(score_function2(ctx_hidden, qry_hidden))
    ref = _reference(ctx_hidden, qry_hidden)
    assert scores.shape == (N,)
    assert jnp.allclose(scores, ref, atol=1e-5, rtol=1e-5)

    # Test 2: bf16 inputs (the intended production dtype: halved DMA bytes),
    # multi-step parallel grid with a ragged last tile.
    N2, S2, D2 = 200, 4, 256
    ctx_bf = jax.random.normal(k3, (N2, S2, D2), jnp.float32).astype(jnp.bfloat16)
    qry_bf = jax.random.normal(k4, (1, S2, D2), jnp.float32).astype(jnp.bfloat16)
    scores2 = jax.block_until_ready(score_function2(ctx_bf, qry_bf))
    ref2 = _reference(ctx_bf, qry_bf)
    assert scores2.shape == (N2,)
    assert jnp.allclose(scores2, ref2, atol=3e-2, rtol=3e-2)

    print("KERNEL_OK")
</pallas_src>

<mosaic_0001>
module attributes {stable_mosaic.version = 11 : i64} {
  func.func @_score_kernel(%arg0: i32, %arg1: memref<8x128xf32, #tpu.memory_space<vmem>>, %arg2: memref<1x128xf32, #tpu.memory_space<vmem>>, %arg3: memref<1x8xf32, #tpu.memory_space<vmem>>) attributes {dimension_semantics = [#tpu.dimension_semantics<parallel>], iteration_bounds = array<i64: 1>, scalar_prefetch = 0 : i64, scratch_operands = 0 : i64, tpu.core_type = #tpu.core_type<tc>, window_params = [{transform_indices = @transform_0, window_bounds = array<i64: 8, 128>}, {transform_indices = @transform_1, window_bounds = array<i64: 1, 128>}, {transform_indices = @transform_2, window_bounds = array<i64: 1, 8>}]} {
    %c0 = arith.constant 0 : index
    %c0_0 = arith.constant 0 : index
    %0 = vector.load %arg1[%c0, %c0_0] : memref<8x128xf32, #tpu.memory_space<vmem>>, vector<8x128xf32>
    %c0_1 = arith.constant 0 : index
    %c0_2 = arith.constant 0 : index
    %1 = vector.load %arg2[%c0_1, %c0_2] : memref<1x128xf32, #tpu.memory_space<vmem>>, vector<1x128xf32>
    %2 = arith.mulf %1, %1 : vector<1x128xf32>
    %cst = arith.constant dense<0.000000e+00> : vector<1xf32>
    %3 = vector.multi_reduction <add>, %2, %cst [1] : vector<1x128xf32> to vector<1xf32>
    %4 = vector.shape_cast %3 : vector<1xf32> to vector<1x1xf32>
    %cst_3 = arith.constant 1.000000e-24 : f32
    %5 = vector.broadcast %cst_3 : f32 to vector<1x1xf32>
    %6 = arith.maximumf %4, %5 : vector<1x1xf32>
    %7 = math.rsqrt %6 : vector<1x1xf32>
    %c0_4 = arith.constant 0 : index
    %c0_5 = arith.constant 0 : index
    %8 = vector.load %arg2[%c0_4, %c0_5] : memref<1x128xf32, #tpu.memory_space<vmem>>, vector<1x128xf32>
    %cst_6 = arith.constant dense<0.000000e+00> : vector<1x8xf32>
    %9 = tpu.matmul %8, %0, %cst_6 {dimension_numbers = #tpu.dot_dimension_numbers<[1], [1], [0], [0], [0, 0, 1, 0], [], []>} : vector<1x128xf32>, vector<8x128xf32>, vector<1x8xf32> -> vector<1x8xf32>
    %10 = arith.mulf %0, %0 : vector<8x128xf32>
    %cst_7 = arith.constant 1.000000e+00 : f32
    %11 = vector.broadcast %cst_7 : f32 to vector<1x128xf32>
    %cst_8 = arith.constant dense<0.000000e+00> : vector<1x8xf32>
    %12 = tpu.matmul %11, %10, %cst_8 {dimension_numbers = #tpu.dot_dimension_numbers<[1], [1], [0], [0], [0, 0, 1, 0], [], []>} : vector<1x128xf32>, vector<8x128xf32>, vector<1x8xf32> -> vector<1x8xf32>
    %cst_9 = arith.constant 1.000000e-24 : f32
    %13 = vector.broadcast %cst_9 : f32 to vector<1x8xf32>
    %14 = arith.maximumf %12, %13 : vector<1x8xf32>
    %15 = math.rsqrt %14 : vector<1x8xf32>
    %16 = arith.mulf %9, %15 : vector<1x8xf32>
    %17 = vector.broadcast %7 : vector<1x1xf32> to vector<1x8xf32>
    %18 = arith.mulf %16, %17 : vector<1x8xf32>
    %c0_10 = arith.constant 0 : index
    %c0_11 = arith.constant 0 : index
    %19 = vector.load %arg3[%c0_10, %c0_11] : memref<1x8xf32, #tpu.memory_space<vmem>>, vector<1x8xf32>
    tpu.vector_store %arg3[%c0_10, %c0_11], %18 {strides = array<i32>} : memref<1x8xf32, #tpu.memory_space<vmem>>, vector<1x8xf32>,
    return
  }
  func.func @transform_0(%arg0: i32) -> (i32, i32) {
    %c0_i32 = arith.constant 0 : i32
    %c0_i32_0 = arith.constant 0 : i32
    return %arg0, %c0_i32 : i32, i32
  }
  func.func @transform_1(%arg0: i32) -> (i32, i32) {
    %c0_i32 = arith.constant 0 : i32
    %c0_i32_0 = arith.constant 0 : i32
    %c0_i32_1 = arith.constant 0 : i32
    return %c0_i32, %c0_i32_0 : i32, i32
  }
  func.func @transform_2(%arg0: i32) -> (i32, i32) {
    %c0_i32 = arith.constant 0 : i32
    %c0_i32_0 = arith.constant 0 : i32
    return %c0_i32, %arg0 : i32, i32
  }
}

</mosaic_0001>

<bundles_post_ra>
// kernel: tpu_custom_call.1
= control target key start
LH: loop header
LB: loop body
LE: loop exit
PB: predicated region body
PF: predicated region fallthrough
CT: control target
= control target key end

     0   :  { %7 = vsyncpa [#allocation3], 0  ;;  %s328_s0 = inlined_call_operand.hbm [shape: f32[8,1024], index: 0, kind: input, shape index: {}]   ;;  %s329_s1 = inlined_call_operand.hbm [shape: f32[1,1024], index: 1, kind: input, shape index: {}]   ;;  %s330_s2 = inlined_call_operand.hbm [shape: f32[1,8], index: 2, kind: output, shape index: {}]  }
   0x1   :  { %8 = vsyncpa [#allocation6], 0 }
   0x2   :  { %9 = vsyncpa [#allocation4], 0  ;;  %s298_s9 = smov [#allocation2]   ;;  %s299_s11 = smov [#allocation5]  }
   0x3   :  { %s16_s10 = sshll.u32 %s298_s9, 4  ;;  %s26_s12 = sshll.u32 %s299_s11, 4  ;;  %s17_s10 = int_to_ptr.vmem [resolvable:$true] %s16_s10  ;;  %s27_s12 = int_to_ptr.vmem [resolvable:$true] %s26_s12 }
   0x4   :  { %s240_s13 = scalar_lea.vmem %s17_s10, 128  ;;  %p245_p1 = scmp.lt.s32.totalorder %s17_s10, %s17_s10 }
   0x5   :  { %p241_p0 = scmp.ne.s32.totalorder %s17_s10, %s240_s13  ;;  %p246_p2 = scmp.lt.s32.totalorder %s240_s13, %s240_s13 }
   0x7   :  { %p247_p3 = por %p246_p2, %p245_p1 }
   0x9   :  { %p248_p4 = pnand %p247_p3, %p241_p0 }
   0xb   :  { %251 = shalt.err (!%p248_p4)
}
   0xc   :  { %19 = dma.hbm_to_vmem [thread:$0]  %s328_s0, 128, %s17_s10, [#allocation3]  }
   0xd   :  { %s260_s16 = scalar_lea.vmem %s27_s12, 16  ;;  %s264_s17 = scalar_lea.vmem %s27_s12, 32 }
   0xe   :  { %p261_p5 = scmp.ne.s32.totalorder %s27_s12, %s260_s16  ;;  %p265_p6 = scmp.lt.s32.totalorder %s27_s12, %s27_s12 }
   0xf   :  { %p266_p7 = scmp.lt.s32.totalorder %s264_s17, %s260_s16 }
  0x11   :  { %p267_p8 = por %p266_p7, %p265_p6 }
  0x13   :  { %p268_p9 = pnand %p267_p8, %p261_p5 }
  0x15   :  { %271 = shalt.err (!%p268_p9)
}
  0x16   :  { %29 = dma.hbm_to_vmem [thread:$0]  %s329_s1, 16, %s27_s12, [#allocation6]  }
  0x17   :  { %292 = dma.done.wait [#allocation3], 128  }
  0x18   :  { %293 = vsyncadd [#allocation3], 4294967168 }
  0x19   :  { %294 = dma.done.wait [#allocation6], 16  }
  0x1a   :  { %295 = vsyncadd [#allocation6], 4294967280  ;;  %v300_v0 = vmov 0.0   ;;  %vm301_vm0 = vmmov 0   ;;  %v36_v1 = vld [vmem:[#allocation2] sm:$0xff]  ;;  %vm39_vm1 = vcmask 1040384  }
  0x1b   :  { %217 = vmatprep.subr.mxu1 %v300_v0  ;;  %219 = vmatprep.mubr.msk.f32.mxu1 %vm301_vm0, %v300_v0  ;;  %v37_v2 = vld [vmem:[#allocation5] sm:$0x1]  ;;  %v115_v3 = vmul.f32 %v36_v1, %v36_v1  ;;  %v302_v6 = vmov 1.0   ;;  %s303_s0 = smov [#allocation7]   ;;  %vm190_vm2 = vcmask 57344  }
  0x1c   :  { %212 = vmatprep.subr.mxu0 %v300_v0  ;;  %214 = vmatprep.mubr.msk.f32.mxu0 %vm301_vm0, %v300_v0  ;;  %v38_v4 = vmul.f32 %v37_v2, %v37_v2  ;;  %s198_s1 = sshll.u32 %s303_s0, 4  ;;  %s199_s1 = int_to_ptr.vmem [resolvable:$true] %s198_s1 }
  0x1d   :  { %213 = vmatpush3.xpose.msra.mxu0 %v36_v1  ;;  %218 = vmatpush3.xpose.msra.mxu1 %v115_v3  ;;  %s272_s20 = scalar_lea.vmem %s199_s1, 16  ;;  %s276_s21 = scalar_lea.vmem %s199_s1, 32 }
  0x1e   :  { %v40_v5 = vsel %vm39_vm1, %v38_v4, 0.0  ;;  %p273_p10 = scmp.ne.s32.totalorder %s199_s1, %s272_s20  ;;  %p277_p11 = scmp.lt.s32.totalorder %s199_s1, %s199_s1 }
  0x1f   :  { %41 = vadd.xlane.f32.xlu0 %v40_v5  ;;  %p278_p12 = scmp.lt.s32.totalorder %s276_s21, %s272_s20 }
  0x20   :  { %215 = vmatmul.mubr.f32.vlgmr.msra.gmra.mxu0 %v37_v2  ;;  %220 = vmatmul.mubr.f32.vlgmr.msra.gmra.mxu1 %v302_v6 }
  0x21   :  { %p279_p13 = por %p278_p12, %p277_p11 }
  0x23   :  { %p280_p0 = pnand %p279_p13, %p273_p10 }
  0xa8   :  { %v42_v7 = vpop.xlane.xlu0 %41 }
  0xa9   :  { %v43_v8 = vmax.f32 %v42_v7, 1e-24 }
  0xab   :  { %228 = vrsqrt.f32 %v43_v8 }
  0xb8   :  { %v229_v14 = vpop.eup %228 }
  0xe0   :  { %v111_v9 = vpop.f32.mrf.mxu0  ;;  %v182_v10 = vpop.f32.mrf.mxu1 }
  0xe1   :  { %v186_v12 = vmax.f32 %v182_v10, 1e-24 }
  0xe2   :  { %v216_v11 = vpop.f32.mrf.mxu0  ;;  %v221_v13 = vpop.f32.mrf.mxu1 }
  0xe3   :  { %230 = vrsqrt.f32 %v186_v12 }
  0xf0   :  { %v231_v15 = vpop.eup %230 }
  0xf1   :  { %v188_v16 = vmul.f32 %v231_v15, %v111_v9 }
  0xf3   :  { %v189_v17 = vmul.f32 %v229_v14, %v188_v16 }
  0xf5   :  { %191 = vst.msk [vmem:[#allocation7] sm:$0x1] %vm190_vm2, %v189_v17 }
  0xf6   :  { %283 = shalt.err (!%p280_p0)
}
  0xf7   :  { %201 = dma.vmem_to_hbm [thread:$0]  %s199_s1, 16, %s330_s2, [#allocation4]  }
  0xf8   :  { %296 = dma.done.wait [#allocation4], 16  }
  0xf9   :  { %297 = vsyncadd [#allocation4], 4294967280 }
  0xfa   :  { %205 = vsyncpa [#allocation3], 1 }
  0xfb   :  { %206 = vsyncpa [#allocation6], 1 }
  0xfc   :  { %207 = vsyncpa [#allocation4], 1 }

</bundles_post_ra>
